<compile_context>
chip_gen: v7x
topology: tpu7x:2x2x1
jax: 0.10.0
libtpu: 0.0.40
codegen_flags: <defaults>
</compile_context>

<pallas_src>
import jax
import jax.numpy as jnp
from jax.experimental import pallas as pl
from jax.experimental.pallas import tpu as pltpu

D_IN = 82          # logical input features
D_IN_PAD = 128     # lane-padded input features (in-kernel pad)
D_H1, D_H2, D_H3 = 256, 256, 128
D_OUT = 64         # output features (no padding)


def _policy_kernel(x_ref,
                   w1_ref, b1_ref,
                   w2_ref, b2_ref,
                   w3_ref, b3_ref,
                   w4_ref, b4_ref,
                   o_ref,
                   xpad_ref):
    # x_ref: (TB, 82) f32 ; weights bf16 ; biases (1, N) f32 ; o_ref (TB, 64) f32
    # xpad_ref: (TB, 128) f32 VMEM scratch used to lane-pad x for a K=128 dot.
    tb = xpad_ref.shape[0]

    # Zero the padding lanes every step (cheap; keeps the scratch correct on
    # every core when the grid is sharded across TensorCores), then drop the
    # real 82 feature lanes in.
    xpad_ref[:, D_IN:] = jnp.zeros((tb, D_IN_PAD - D_IN), xpad_ref.dtype)
    xpad_ref[:, :D_IN] = x_ref[...]

    # Layer 1: (TB,128)@(128,256) -> f32 acc -> +b -> ReLU -> bf16
    h = jnp.dot(xpad_ref[...].astype(jnp.bfloat16), w1_ref[...],
                preferred_element_type=jnp.float32)
    h = jnp.maximum(h + b1_ref[...], 0.0).astype(jnp.bfloat16)
    # Layer 2: (TB,256)@(256,256)
    h = jnp.dot(h, w2_ref[...], preferred_element_type=jnp.float32)
    h = jnp.maximum(h + b2_ref[...], 0.0).astype(jnp.bfloat16)
    # Layer 3: (TB,256)@(256,128)
    h = jnp.dot(h, w3_ref[...], preferred_element_type=jnp.float32)
    h = jnp.maximum(h + b3_ref[...], 0.0).astype(jnp.bfloat16)
    # Layer 4: (TB,128)@(128,64) (no activation)
    h = jnp.dot(h, w4_ref[...], preferred_element_type=jnp.float32)
    o_ref[...] = (h + b4_ref[...]).astype(o_ref.dtype)


def prepare_params(params):
    """One-time prep: cast weights to bf16, lane-pad W1 rows 82->128, keep
    biases as (1, N) f32. Hoisted out of the forward so repeated calls pay no
    per-call weight traffic / XLA launches."""
    w1, b1, w2, b2, w3, b3, w4, b4 = params
    w1_p = jnp.zeros((D_IN_PAD, D_H1), jnp.bfloat16).at[:D_IN, :].set(
        w1.astype(jnp.bfloat16))
    return (w1_p, jnp.reshape(b1, (1, D_H1)).astype(jnp.float32),
            w2.astype(jnp.bfloat16), jnp.reshape(b2, (1, D_H2)).astype(jnp.float32),
            w3.astype(jnp.bfloat16), jnp.reshape(b3, (1, D_H3)).astype(jnp.float32),
            w4.astype(jnp.bfloat16), jnp.reshape(b4, (1, D_OUT)).astype(jnp.float32))


def _pick_tb(B, tb_cap):
    """Batch-tile heuristic:
      * tiny batches: a single minimal tile (multiple of 8 rows, f32 sublane)
        so we don't burn 7-15x padded rows through four layers;
      * otherwise: 128-row-aligned tiles targeting >= 2 grid steps (so both
        v7x TensorCores get work), capped at tb_cap to amortize the ~0.35 us
        per-step overhead for large B."""
    if B <= 64:
        return 8 * pl.cdiv(B, 8)
    b128 = 128 * pl.cdiv(B, 128)
    half = 128 * pl.cdiv(b128 // 2, 128)
    return int(min(tb_cap, max(128, half)))


def policy_forward(x, prepared_params, *, tb=1024):
    """x: (B, 82) float32 -> (B, 64) float32. `prepared_params` from
    prepare_params()."""
    B, F = x.shape
    assert F == D_IN, F
    w1_p, b1_f, w2_b, b2_f, w3_b, b3_f, w4_b, b4_f = prepared_params

    TB = _pick_tb(B, tb)
    B_pad = TB * pl.cdiv(B, TB)

    # Only row-pad when B isn't a tile multiple (never lane-pad on the host).
    x_in = x if B_pad == B else jnp.pad(x, ((0, B_pad - B), (0, 0)))

    grid = (B_pad // TB,)

    def resident(shape):
        # Full-array block with a constant index_map -> stays VMEM-resident.
        return pl.BlockSpec(shape, lambda i: (0, 0))

    flops = 2 * B_pad * (D_IN_PAD * D_H1 + D_H1 * D_H2 + D_H2 * D_H3
                         + D_H3 * D_OUT)
    bytes_accessed = (
        B_pad * D_IN * 4 + B_pad * D_OUT * 4
        + (w1_p.size + w2_b.size + w3_b.size + w4_b.size) * 2
        + (b1_f.size + b2_f.size + b3_f.size + b4_f.size) * 4)

    out = pl.pallas_call(
        _policy_kernel,
        out_shape=jax.ShapeDtypeStruct((B_pad, D_OUT), jnp.float32),
        grid_spec=pltpu.PrefetchScalarGridSpec(
            num_scalar_prefetch=0,
            grid=grid,
            in_specs=[
                pl.BlockSpec((TB, D_IN), lambda i: (i, 0)),        # x (pipelined)
                resident((D_IN_PAD, D_H1)), resident((1, D_H1)),   # layer 1
                resident((D_H1, D_H2)), resident((1, D_H2)),       # layer 2
                resident((D_H2, D_H3)), resident((1, D_H3)),       # layer 3
                resident((D_H3, D_OUT)), resident((1, D_OUT)),     # layer 4
            ],
            out_specs=pl.BlockSpec((TB, D_OUT), lambda i: (i, 0)),
            scratch_shapes=[pltpu.VMEM((TB, D_IN_PAD), jnp.float32)],
        ),
        compiler_params=pltpu.CompilerParams(
            dimension_semantics=("parallel",)),
        cost_estimate=pl.CostEstimate(
            flops=flops, transcendentals=0, bytes_accessed=bytes_accessed),
    )(x_in, w1_p, b1_f, w2_b, b2_f, w3_b, b3_f, w4_b, b4_f)

    return out if B_pad == B else out[:B]


def init_params(key):
    """Deterministic synthetic params. Shapes mirror the PyTorch module
    (weights stored transposed: (in, out)); biases kept 2D (1, out)."""
    dims = [(D_IN, D_H1), (D_H1, D_H2), (D_H2, D_H3), (D_H3, D_OUT)]
    params = []
    for d_in, d_out in dims:
        kw, kb, key = jax.random.split(key, 3)
        bound = 1.0 / (d_in ** 0.5)  # same scale as PyTorch's default init
        w = jax.random.uniform(kw, (d_in, d_out), jnp.float32, -bound, bound)
        b = jax.random.uniform(kb, (1, d_out), jnp.float32, -bound, bound)
        params += [w, b]
    return tuple(params)


def policy_reference(x, params):
    """Pure-JAX reference emulating the kernel's bf16-operand / f32-accumulate
    numerics (tolerance only has to absorb accumulation order, not bf16
    quantization)."""
    w1, b1, w2, b2, w3, b3, w4, b4 = params

    def mm(a, w):
        a16 = a.astype(jnp.bfloat16).astype(jnp.float32)
        w16 = w.astype(jnp.bfloat16).astype(jnp.float32)
        return jnp.dot(a16, w16)

    h = jnp.maximum(mm(x, w1) + b1, 0.0)
    h = jnp.maximum(mm(h, w2) + b2, 0.0)
    h = jnp.maximum(mm(h, w3) + b3, 0.0)
    return mm(h, w4) + b4


if __name__ == "__main__":
    key = jax.random.PRNGKey(0)
    kx, kp = jax.random.split(key)

    B = 8
    x = jax.random.normal(kx, (B, D_IN), dtype=jnp.float32)
    params = init_params(kp)
    prepared = prepare_params(params)   # one-time weight prep (bf16 + W1 pad)

    out = policy_forward(x, prepared)
    out = jax.block_until_ready(out)

    ref = policy_reference(x, params)
    assert out.shape == (B, D_OUT), out.shape
    assert jnp.allclose(out, ref, atol=1e-2, rtol=1e-2), "mismatch vs reference"

    print("KERNEL_OK")
</pallas_src>

<mosaic_0001>
module attributes {stable_mosaic.version = 11 : i64} {
  func.func @_policy_kernel(%arg0: i32, %arg1: memref<8x82xf32, #tpu.memory_space<vmem>>, %arg2: memref<128x256xbf16, #tpu.memory_space<vmem>>, %arg3: memref<1x256xf32, #tpu.memory_space<vmem>>, %arg4: memref<256x256xbf16, #tpu.memory_space<vmem>>, %arg5: memref<1x256xf32, #tpu.memory_space<vmem>>, %arg6: memref<256x128xbf16, #tpu.memory_space<vmem>>, %arg7: memref<1x128xf32, #tpu.memory_space<vmem>>, %arg8: memref<128x64xbf16, #tpu.memory_space<vmem>>, %arg9: memref<1x64xf32, #tpu.memory_space<vmem>>, %arg10: memref<8x64xf32, #tpu.memory_space<vmem>>, %arg11: memref<8x128xf32, #tpu.memory_space<vmem>>) attributes {dimension_semantics = [#tpu.dimension_semantics<parallel>], iteration_bounds = array<i64: 1>, scalar_prefetch = 0 : i64, scratch_operands = 1 : i64, tpu.core_type = #tpu.core_type<tc>, window_params = [{transform_indices = @transform_0, window_bounds = array<i64: 8, 82>}, {pipeline_mode = #tpu.pipeline_mode<synchronous>, transform_indices = @transform_1, window_bounds = array<i64: 128, 256>}, {pipeline_mode = #tpu.pipeline_mode<synchronous>, transform_indices = @transform_2, window_bounds = array<i64: 1, 256>}, {pipeline_mode = #tpu.pipeline_mode<synchronous>, transform_indices = @transform_3, window_bounds = array<i64: 256, 256>}, {pipeline_mode = #tpu.pipeline_mode<synchronous>, transform_indices = @transform_4, window_bounds = array<i64: 1, 256>}, {pipeline_mode = #tpu.pipeline_mode<synchronous>, transform_indices = @transform_5, window_bounds = array<i64: 256, 128>}, {pipeline_mode = #tpu.pipeline_mode<synchronous>, transform_indices = @transform_6, window_bounds = array<i64: 1, 128>}, {pipeline_mode = #tpu.pipeline_mode<synchronous>, transform_indices = @transform_7, window_bounds = array<i64: 128, 64>}, {pipeline_mode = #tpu.pipeline_mode<synchronous>, transform_indices = @transform_8, window_bounds = array<i64: 1, 64>}, {transform_indices = @transform_9, window_bounds = array<i64: 8, 64>}]} {
    %cst = arith.constant 0.000000e+00 : f32
    %0 = vector.broadcast %cst : f32 to vector<8x46xf32>
    %c0 = arith.constant 0 : index
    %c82 = arith.constant 82 : index
    %1 = vector.load %arg11[%c0, %c82] : memref<8x128xf32, #tpu.memory_space<vmem>>, vector<8x46xf32>
    tpu.vector_store %arg11[%c0, %c82], %0 {strides = array<i32>} : memref<8x128xf32, #tpu.memory_space<vmem>>, vector<8x46xf32>,
    %c0_0 = arith.constant 0 : index
    %c0_1 = arith.constant 0 : index
    %2 = vector.load %arg1[%c0_0, %c0_1] : memref<8x82xf32, #tpu.memory_space<vmem>>, vector<8x82xf32>
    %c0_2 = arith.constant 0 : index
    %c0_3 = arith.constant 0 : index
    %3 = vector.load %arg11[%c0_2, %c0_3] : memref<8x128xf32, #tpu.memory_space<vmem>>, vector<8x82xf32>
    tpu.vector_store %arg11[%c0_2, %c0_3], %2 {strides = array<i32>} : memref<8x128xf32, #tpu.memory_space<vmem>>, vector<8x82xf32>,
    %c0_4 = arith.constant 0 : index
    %c0_5 = arith.constant 0 : index
    %4 = vector.load %arg11[%c0_4, %c0_5] : memref<8x128xf32, #tpu.memory_space<vmem>>, vector<8x128xf32>
    %5 = arith.truncf %4 : vector<8x128xf32> to vector<8x128xbf16>
    %c0_6 = arith.constant 0 : index
    %c0_7 = arith.constant 0 : index
    %6 = vector.load %arg2[%c0_6, %c0_7] : memref<128x256xbf16, #tpu.memory_space<vmem>>, vector<128x256xbf16>
    %cst_8 = arith.constant dense<0.000000e+00> : vector<8x256xf32>
    %7 = tpu.matmul %5, %6, %cst_8 {dimension_numbers = #tpu.dot_dimension_numbers<[1], [0], [0], [1], [0, 0, 1, 1], [], []>} : vector<8x128xbf16>, vector<128x256xbf16>, vector<8x256xf32> -> vector<8x256xf32>
    %c0_9 = arith.constant 0 : index
    %c0_10 = arith.constant 0 : index
    %8 = vector.load %arg3[%c0_9, %c0_10] : memref<1x256xf32, #tpu.memory_space<vmem>>, vector<1x256xf32>
    %9 = vector.broadcast %8 : vector<1x256xf32> to vector<8x256xf32>
    %10 = arith.addf %7, %9 : vector<8x256xf32>
    %cst_11 = arith.constant 0.000000e+00 : f32
    %11 = vector.broadcast %cst_11 : f32 to vector<8x256xf32>
    %12 = arith.maximumf %10, %11 : vector<8x256xf32>
    %13 = arith.truncf %12 : vector<8x256xf32> to vector<8x256xbf16>
    %c0_12 = arith.constant 0 : index
    %c0_13 = arith.constant 0 : index
    %14 = vector.load %arg4[%c0_12, %c0_13] : memref<256x256xbf16, #tpu.memory_space<vmem>>, vector<256x256xbf16>
    %cst_14 = arith.constant dense<0.000000e+00> : vector<8x256xf32>
    %15 = tpu.matmul %13, %14, %cst_14 {dimension_numbers = #tpu.dot_dimension_numbers<[1], [0], [0], [1], [0, 0, 1, 1], [], []>} : vector<8x256xbf16>, vector<256x256xbf16>, vector<8x256xf32> -> vector<8x256xf32>
    %c0_15 = arith.constant 0 : index
    %c0_16 = arith.constant 0 : index
    %16 = vector.load %arg5[%c0_15, %c0_16] : memref<1x256xf32, #tpu.memory_space<vmem>>, vector<1x256xf32>
    %17 = vector.broadcast %16 : vector<1x256xf32> to vector<8x256xf32>
    %18 = arith.addf %15, %17 : vector<8x256xf32>
    %cst_17 = arith.constant 0.000000e+00 : f32
    %19 = vector.broadcast %cst_17 : f32 to vector<8x256xf32>
    %20 = arith.maximumf %18, %19 : vector<8x256xf32>
    %21 = arith.truncf %20 : vector<8x256xf32> to vector<8x256xbf16>
    %c0_18 = arith.constant 0 : index
    %c0_19 = arith.constant 0 : index
    %22 = vector.load %arg6[%c0_18, %c0_19] : memref<256x128xbf16, #tpu.memory_space<vmem>>, vector<256x128xbf16>
    %cst_20 = arith.constant dense<0.000000e+00> : vector<8x128xf32>
    %23 = tpu.matmul %21, %22, %cst_20 {dimension_numbers = #tpu.dot_dimension_numbers<[1], [0], [0], [1], [0, 0, 1, 1], [], []>} : vector<8x256xbf16>, vector<256x128xbf16>, vector<8x128xf32> -> vector<8x128xf32>
    %c0_21 = arith.constant 0 : index
    %c0_22 = arith.constant 0 : index
    %24 = vector.load %arg7[%c0_21, %c0_22] : memref<1x128xf32, #tpu.memory_space<vmem>>, vector<1x128xf32>
    %25 = vector.broadcast %24 : vector<1x128xf32> to vector<8x128xf32>
    %26 = arith.addf %23, %25 : vector<8x128xf32>
    %cst_23 = arith.constant 0.000000e+00 : f32
    %27 = vector.broadcast %cst_23 : f32 to vector<8x128xf32>
    %28 = arith.maximumf %26, %27 : vector<8x128xf32>
    %29 = arith.truncf %28 : vector<8x128xf32> to vector<8x128xbf16>
    %c0_24 = arith.constant 0 : index
    %c0_25 = arith.constant 0 : index
    %30 = vector.load %arg8[%c0_24, %c0_25] : memref<128x64xbf16, #tpu.memory_space<vmem>>, vector<128x64xbf16>
    %cst_26 = arith.constant dense<0.000000e+00> : vector<8x64xf32>
    %31 = tpu.matmul %29, %30, %cst_26 {dimension_numbers = #tpu.dot_dimension_numbers<[1], [0], [0], [1], [0, 0, 1, 1], [], []>} : vector<8x128xbf16>, vector<128x64xbf16>, vector<8x64xf32> -> vector<8x64xf32>
    %c0_27 = arith.constant 0 : index
    %c0_28 = arith.constant 0 : index
    %32 = vector.load %arg9[%c0_27, %c0_28] : memref<1x64xf32, #tpu.memory_space<vmem>>, vector<1x64xf32>
    %33 = vector.broadcast %32 : vector<1x64xf32> to vector<8x64xf32>
    %34 = arith.addf %31, %33 : vector<8x64xf32>
    %c0_29 = arith.constant 0 : index
    %c0_30 = arith.constant 0 : index
    %35 = vector.load %arg10[%c0_29, %c0_30] : memref<8x64xf32, #tpu.memory_space<vmem>>, vector<8x64xf32>
    tpu.vector_store %arg10[%c0_29, %c0_30], %34 {strides = array<i32>} : memref<8x64xf32, #tpu.memory_space<vmem>>, vector<8x64xf32>,
    return
  }
  func.func @transform_0(%arg0: i32) -> (i32, i32) {
    %c0_i32 = arith.constant 0 : i32
    %c0_i32_0 = arith.constant 0 : i32
    return %arg0, %c0_i32 : i32, i32
  }
  func.func @transform_1(%arg0: i32) -> (i32, i32) {
    %c0_i32 = arith.constant 0 : i32
    %c0_i32_0 = arith.constant 0 : i32
    %c0_i32_1 = arith.constant 0 : i32
    return %c0_i32, %c0_i32_0 : i32, i32
  }
  func.func @transform_2(%arg0: i32) -> (i32, i32) {
    %c0_i32 = arith.constant 0 : i32
    %c0_i32_0 = arith.constant 0 : i32
    %c0_i32_1 = arith.constant 0 : i32
    return %c0_i32, %c0_i32_0 : i32, i32
  }
  func.func @transform_3(%arg0: i32) -> (i32, i32) {
    %c0_i32 = arith.constant 0 : i32
    %c0_i32_0 = arith.constant 0 : i32
    %c0_i32_1 = arith.constant 0 : i32
    return %c0_i32, %c0_i32_0 : i32, i32
  }
  func.func @transform_4(%arg0: i32) -> (i32, i32) {
    %c0_i32 = arith.constant 0 : i32
    %c0_i32_0 = arith.constant 0 : i32
    %c0_i32_1 = arith.constant 0 : i32
    return %c0_i32, %c0_i32_0 : i32, i32
  }
  func.func @transform_5(%arg0: i32) -> (i32, i32) {
    %c0_i32 = arith.constant 0 : i32
    %c0_i32_0 = arith.constant 0 : i32
    %c0_i32_1 = arith.constant 0 : i32
    return %c0_i32, %c0_i32_0 : i32, i32
  }
  func.func @transform_6(%arg0: i32) -> (i32, i32) {
    %c0_i32 = arith.constant 0 : i32
    %c0_i32_0 = arith.constant 0 : i32
    %c0_i32_1 = arith.constant 0 : i32
    return %c0_i32, %c0_i32_0 : i32, i32
  }
  func.func @transform_7(%arg0: i32) -> (i32, i32) {
    %c0_i32 = arith.constant 0 : i32
    %c0_i32_0 = arith.constant 0 : i32
    %c0_i32_1 = arith.constant 0 : i32
    return %c0_i32, %c0_i32_0 : i32, i32
  }
  func.func @transform_8(%arg0: i32) -> (i32, i32) {
    %c0_i32 = arith.constant 0 : i32
    %c0_i32_0 = arith.constant 0 : i32
    %c0_i32_1 = arith.constant 0 : i32
    return %c0_i32, %c0_i32_0 : i32, i32
  }
  func.func @transform_9(%arg0: i32) -> (i32, i32) {
    %c0_i32 = arith.constant 0 : i32
    %c0_i32_0 = arith.constant 0 : i32
    return %arg0, %c0_i32 : i32, i32
  }
}

</mosaic_0001>

<bundles_post_ra>
// kernel: tpu_custom_call.1
= control target key start
LH: loop header
LB: loop body
LE: loop exit
PB: predicated region body
PF: predicated region fallthrough
CT: control target
= control target key end

     0   :  { %14 = vsyncpa [#allocation4], 0  ;;  %s1281_s0 = inlined_call_operand.vmem [shape: f32[8,82], index: 0, kind: input, shape index: {}]   ;;  %s1282_s1 = inlined_call_operand.hbm [shape: bf16[128,256], index: 1, kind: input, shape index: {}]   ;;  %s1283_s2 = inlined_call_operand.vmem [shape: f32[1,256], index: 2, kind: input, shape index: {}]   ;;  %s1284_s3 = inlined_call_operand.hbm [shape: bf16[256,256], index: 3, kind: input, shape index: {}]   ;;  %s1285_s4 = inlined_call_operand.vmem [shape: f32[1,256], index: 4, kind: input, shape index: {}]   ;;  %s1286_s5 = inlined_call_operand.hbm [shape: bf16[256,128], index: 5, kind: input, shape index: {}]   ;;  %s1287_s6 = inlined_call_operand.vmem [shape: f32[1,128], index: 6, kind: input, shape index: {}]   ;;  %s1288_s7 = inlined_call_operand.vmem [shape: bf16[128,64], index: 7, kind: input, shape index: {}]   ;;  %s1289_s8 = inlined_call_operand.vmem [shape: f32[1,64], index: 8, kind: input, shape index: {}]   ;;  %s1290_s9 = inlined_call_operand.hbm [shape: f32[8,64], index: 9, kind: output, shape index: {}]  }
   0x1   :  { %15 = vsyncpa [#allocation7], 0 }
   0x2   :  { %16 = vsyncpa [#allocation5], 0  ;;  %s1116_s30 = smov [#allocation6]   ;;  %s1117_s11 = smov [#allocation3]  }
   0x3   :  { %s38_s10 = sshll.u32 %s1116_s30, 4  ;;  %s24_s12 = sshll.u32 %s1117_s11, 4  ;;  %s39_s10 = int_to_ptr.vmem [resolvable:$true] %s38_s10  ;;  %s1177_s12 = int_to_ptr.vmem [resolvable:$true] %s24_s12 }
   0x4   :  { %s1022_s15 = scalar_lea.hbm %s1284_s3, 4096 }
   0x5   :  { %p1023_p0 = scmp.ne.s32.totalorder %s1284_s3, %s1022_s15  ;;  %p1026_p1 = scmp.lt.u32.totalorder %s1022_s15, %s1284_s3 }
   0x7   :  { %p1028_p2 = pnand %p1026_p1, %p1023_p0 }
   0x9   :  { %1031 = shalt.err (!%p1028_p2)
}
   0xa   :  { %s1032_s20 = scalar_lea.vmem %s39_s10, 4096  ;;  %p1037_p4 = scmp.lt.s32.totalorder %s39_s10, %s39_s10 }
   0xb   :  { %p1033_p3 = scmp.ne.s32.totalorder %s39_s10, %s1032_s20  ;;  %p1038_p5 = scmp.lt.s32.totalorder %s1032_s20, %s1032_s20 }
   0xd   :  { %p1039_p6 = por %p1038_p5, %p1037_p4 }
   0xf   :  { %p1040_p7 = pnand %p1039_p6, %p1033_p3 }
  0x11   :  { %1043 = shalt.err (!%p1040_p7)
}
  0x12   :  { %s1118_s21 = smov 128   ;;  %s1119_s22 = smov 8  }
  0x13   :  { %44 = dma.hbm_to_vmem [thread:$0]  %s1284_s3, 4096, %s39_s10, [#allocation7], %s1118_s21, %s1118_s21, %s1119_s22  }
  0x14   :  { %s1044_s27 = scalar_lea.hbm %s1282_s1, 2048 }
  0x15   :  { %p1045_p8 = scmp.ne.s32.totalorder %s1282_s1, %s1044_s27  ;;  %p1048_p9 = scmp.lt.u32.totalorder %s1044_s27, %s1282_s1 }
  0x17   :  { %p1050_p10 = pnand %p1048_p9, %p1045_p8 }
  0x19   :  { %1053 = shalt.err (!%p1050_p10)
}
  0x1a   :  { %s1054_s13 = scalar_lea.vmem %s1177_s12, 2048  ;;  %p1059_p12 = scmp.lt.s32.totalorder %s1177_s12, %s1177_s12 }
  0x1b   :  { %p1055_p11 = scmp.ne.s32.totalorder %s1177_s12, %s1054_s13  ;;  %p1060_p13 = scmp.lt.s32.totalorder %s1054_s13, %s1054_s13 }
  0x1d   :  { %p1061_p0 = por %p1060_p13, %p1059_p12 }
  0x1f   :  { %p1062_p1 = pnand %p1061_p0, %p1055_p11 }
  0x21   :  { %1065 = shalt.err (!%p1062_p1)
}
  0x22   :  { %30 = dma.hbm_to_vmem [thread:$0]  %s1282_s1, 2048, %s1177_s12, [#allocation4], %s1118_s21, %s1118_s21, %s1119_s22  }
  0x23   :  { %s1120_s14 = smov [#allocation8]   ;;  %s1066_s18 = scalar_lea.hbm %s1286_s5, 2048 }
  0x24   :  { %s52_s15 = sshll.u32 %s1120_s14, 4  ;;  %p1067_p2 = scmp.ne.s32.totalorder %s1286_s5, %s1066_s18  ;;  %s53_s15 = int_to_ptr.vmem [resolvable:$true] %s52_s15 }
  0x25   :  { %p1070_p3 = scmp.lt.u32.totalorder %s1066_s18, %s1286_s5 }
  0x27   :  { %p1072_p4 = pnand %p1070_p3, %p1067_p2 }
  0x29   :  { %1075 = shalt.err (!%p1072_p4)
}
  0x2a   :  { %s1076_s25 = scalar_lea.vmem %s53_s15, 2048  ;;  %p1081_p6 = scmp.lt.s32.totalorder %s53_s15, %s53_s15 }
  0x2b   :  { %p1077_p5 = scmp.ne.s32.totalorder %s53_s15, %s1076_s25  ;;  %p1082_p7 = scmp.lt.s32.totalorder %s1076_s25, %s1076_s25 }
  0x2d   :  { %p1083_p8 = por %p1082_p7, %p1081_p6 }
  0x2f   :  { %p1084_p9 = pnand %p1083_p8, %p1077_p5 }
  0x31   :  { %1087 = shalt.err (!%p1084_p9)
}
  0x32   :  { %s1121_s1 = smov 64   ;;  %s1122_s12 = smov 4  }
  0x33   :  { %58 = dma.hbm_to_vmem [thread:$0]  %s1286_s5, 2048, %s53_s15, [#allocation7], %s1121_s1, %s1121_s1, %s1122_s12  }
  0x34   :  { %1110 = dma.done.wait [#allocation4], 2048  }
  0x35   :  { %1111 = vsyncadd [#allocation4], 4294965248 }
  0x36   :  { %1112 = dma.done.wait [#allocation7], 6144  }
  0x37   :  { %1113 = vsyncadd [#allocation7], 4294961152  ;;  %vm75_vm0 = vcmask 1048208   ;;  %v1123_v0 = vmov 0   ;;  %v1124_v1 = vmov 0.0   ;;  %vm78_vm1 = vcmask 670720  }
  0x38   :  { %222 = vmatprep.mubr.bf16.mxu0 %v1123_v0  ;;  %76 = vst.msk [vmem:[#allocation2] sm:$0xff] %vm75_vm0, %v1124_v1  ;;  %v926_v2 = vld [vmem:[#allocation3 + $0x4] ss:$8 sps:$4 sm:$0xff]   ;;  %v928_v3 = vld [vmem:[#allocation3] ss:$8 sps:$4 sm:$0xff]   ;;  %v77_v11 = vld [vmem:[%s1281_s0] sm:$0xff] }
  0x39   :  { %190 = vmatprep.subr.bf16.mxu0 %v926_v2  ;;  %v929_v4 = vld [vmem:[#allocation3 + $0x14] ss:$8 sps:$4 sm:$0xff]   ;;  %v931_v5 = vld [vmem:[#allocation3 + $0x10] ss:$8 sps:$4 sm:$0xff]   ;;  %v932_v6 = vld [vmem:[#allocation3 + $0x24] ss:$8 sps:$4 sm:$0xff]   ;;  %v100_v2 = vlaneseq }
  0x3a   :  { %191 = vmatpush1.bf16.msra.mxu0 %v928_v3  ;;  %v934_v7 = vld [vmem:[#allocation3 + $0x20] ss:$8 sps:$4 sm:$0xff]   ;;  %v935_v8 = vld [vmem:[#allocation3 + $0x34] ss:$8 sps:$4 sm:$0xff]   ;;  %v937_v9 = vld [vmem:[#allocation3 + $0x30] ss:$8 sps:$4 sm:$0xff]  }
  0x3b   :  { %192 = vmatprep.subr.bf16.mxu0 %v929_v4  ;;  %v938_v10 = vld [vmem:[#allocation3 + $0x44] ss:$8 sps:$4 sm:$0xff]   ;;  %79 = vst.msk [vmem:[#allocation2] sm:$0xff] %vm78_vm1, %v77_v11  ;;  %v952_v13 = vld [vmem:[#allocation6] ss:$8 sps:$4 sm:$0xff]   ;;  %v1002_v57 = vld [vmem:[#allocation8 + $0x50] sm:$0xff]  }
  0x3c   :  { %v950_v12 = vld [vmem:[#allocation6 + $0x4] ss:$8 sps:$4 sm:$0xff]   ;;  %v953_v14 = vld [vmem:[#allocation6 + $0x14] ss:$8 sps:$4 sm:$0xff]   ;;  %v940_v15 = vld [vmem:[#allocation3 + $0x40] ss:$8 sps:$4 sm:$0xff]  }
  0x3d   :  { %439 = vmatprep.subr.bf16.mxu1 %v950_v12  ;;  %v955_v16 = vld [vmem:[#allocation6 + $0x10] ss:$8 sps:$4 sm:$0xff]   ;;  %v956_v17 = vld [vmem:[#allocation6 + $0x24] ss:$8 sps:$4 sm:$0xff]   ;;  %v941_v18 = vld [vmem:[#allocation3 + $0x54] ss:$8 sps:$4 sm:$0xff]  }
  0x3e   :  { %193 = vmatpush1.bf16.msra.mxu0 %v931_v5  ;;  %440 = vmatpush1.bf16.msra.mxu1 %v952_v13  ;;  %v943_v19 = vld [vmem:[#allocation3 + $0x50] ss:$8 sps:$4 sm:$0xff]   ;;  %v958_v20 = vld [vmem:[#allocation6 + $0x20] ss:$8 sps:$4 sm:$0xff]   ;;  %v959_v21 = vld [vmem:[#allocation6 + $0x34] ss:$8 sps:$4 sm:$0xff]  }
  0x3f   :  { %194 = vmatprep.subr.bf16.mxu0 %v932_v6  ;;  %441 = vmatprep.subr.bf16.mxu1 %v953_v14  ;;  %v944_v22 = vld [vmem:[#allocation3 + $0x64] ss:$8 sps:$4 sm:$0xff]   ;;  %v946_v23 = vld [vmem:[#allocation3 + $0x60] ss:$8 sps:$4 sm:$0xff]   ;;  %v961_v24 = vld [vmem:[#allocation6 + $0x30] ss:$8 sps:$4 sm:$0xff]  }
  0x40   :  { %v962_v25 = vld [vmem:[#allocation6 + $0x44] ss:$8 sps:$4 sm:$0xff]   ;;  %v947_v26 = vld [vmem:[#allocation3 + $0x74] ss:$8 sps:$4 sm:$0xff]   ;;  %v949_v27 = vld [vmem:[#allocation3 + $0x70] ss:$8 sps:$4 sm:$0xff]  }
  0x41   :  { %v964_v28 = vld [vmem:[#allocation6 + $0x40] ss:$8 sps:$4 sm:$0xff]   ;;  %v965_v30 = vld [vmem:[#allocation6 + $0x54] ss:$8 sps:$4 sm:$0xff]   ;;  %v967_v31 = vld [vmem:[#allocation6 + $0x50] ss:$8 sps:$4 sm:$0xff]  }
  0x42   :  { %195 = vmatpush1.bf16.msra.mxu0 %v934_v7  ;;  %442 = vmatpush1.bf16.msra.mxu1 %v955_v16  ;;  %v80_v29 = vld [vmem:[#allocation2] sm:$0xff]  ;;  %v968_v33 = vld [vmem:[#allocation6 + $0x64] ss:$8 sps:$4 sm:$0xff]   ;;  %v970_v34 = vld [vmem:[#allocation6 + $0x60] ss:$8 sps:$4 sm:$0xff]   ;;  %v101_v3 = vshrl.u32 %v100_v2, 7 }
  0x43   :  { %196 = vmatprep.subr.bf16.mxu0 %v935_v8  ;;  %443 = vmatprep.subr.bf16.mxu1 %v956_v17  ;;  %v81_v32 = vpack.c.bf16 %v80_v29, %v80_v29  ;;  %v971_v35 = vld [vmem:[#allocation6 + $0x74] ss:$8 sps:$4 sm:$0xff]   ;;  %v973_v36 = vld [vmem:[#allocation6 + $0x70] ss:$8 sps:$4 sm:$0xff]   ;;  %v974_v37 = vld [vmem:[#allocation6 + $0x84] ss:$8 sps:$4 sm:$0xff]  }
  0x44   :  { %v976_v38 = vld [vmem:[#allocation6 + $0x80] ss:$8 sps:$4 sm:$0xff]   ;;  %v977_v39 = vld [vmem:[#allocation6 + $0x94] ss:$8 sps:$4 sm:$0xff]   ;;  %v979_v40 = vld [vmem:[#allocation6 + $0x90] ss:$8 sps:$4 sm:$0xff]  }
  0x45   :  { %v980_v41 = vld [vmem:[#allocation6 + $0xa4] ss:$8 sps:$4 sm:$0xff]   ;;  %v982_v42 = vld [vmem:[#allocation6 + $0xa0] ss:$8 sps:$4 sm:$0xff]   ;;  %v983_v43 = vld [vmem:[#allocation6 + $0xb4] ss:$8 sps:$4 sm:$0xff]  }
  0x46   :  { %197 = vmatpush1.bf16.msra.mxu0 %v937_v9  ;;  %444 = vmatpush1.bf16.msra.mxu1 %v958_v20  ;;  %v985_v44 = vld [vmem:[#allocation6 + $0xb0] ss:$8 sps:$4 sm:$0xff]   ;;  %v986_v45 = vld [vmem:[#allocation6 + $0xc4] ss:$8 sps:$4 sm:$0xff]   ;;  %v988_v46 = vld [vmem:[#allocation6 + $0xc0] ss:$8 sps:$4 sm:$0xff]  }
  0x47   :  { %198 = vmatprep.subr.bf16.mxu0 %v938_v10  ;;  %445 = vmatprep.subr.bf16.mxu1 %v959_v21  ;;  %v989_v47 = vld [vmem:[#allocation6 + $0xd4] ss:$8 sps:$4 sm:$0xff]   ;;  %v991_v48 = vld [vmem:[#allocation6 + $0xd0] ss:$8 sps:$4 sm:$0xff]   ;;  %v992_v49 = vld [vmem:[#allocation6 + $0xe4] ss:$8 sps:$4 sm:$0xff]  }
  0x48   :  { %v994_v50 = vld [vmem:[#allocation6 + $0xe0] ss:$8 sps:$4 sm:$0xff]   ;;  %v995_v51 = vld [vmem:[#allocation6 + $0xf4] ss:$8 sps:$4 sm:$0xff]   ;;  %v997_v52 = vld [vmem:[#allocation6 + $0xf0] ss:$8 sps:$4 sm:$0xff]  }
  0x49   :  { %v998_v53 = vld [vmem:[#allocation8 + $0x40] sm:$0xff]   ;;  %v1000_v55 = vld [vmem:[#allocation8 + $0x48] sm:$0xff]   ;;  %v1003_v58 = vld [vmem:[#allocation8 + $0x10] sm:$0xff]   ;;  %v102_v4 = vsub.s32 0, %v101_v3  ;;  %v106_v6 = vsub.s32 1, %v101_v3  ;;  %vm1125_vm2 = vmmov 0  }
  0x4a   :  { %199 = vmatpush1.bf16.msra.mxu0 %v940_v15  ;;  %446 = vmatpush1.bf16.msra.mxu1 %v961_v24  ;;  %v999_v54 = vld [vmem:[#allocation8] sm:$0xff]   ;;  %v1001_v56 = vld [vmem:[#allocation8 + $0x8] sm:$0xff]   ;;  %v1004_v59 = vld [vmem:[#allocation8 + $0x58] sm:$0xff]   ;;  %vm772_vm3 = vcmask 523264  }
  0x4b   :  { %200 = vmatprep.subr.bf16.mxu0 %v941_v18  ;;  %447 = vmatprep.subr.bf16.mxu1 %v962_v25  ;;  %v1005_v60 = vld [vmem:[#allocation8 + $0x18] sm:$0xff]   ;;  %v1006_v61 = vld [vmem:[#allocation8 + $0x60] sm:$0xff]   ;;  %v1008_v63 = vld [vmem:[#allocation8 + $0x68] sm:$0xff]  }
  0x4c   :  { %v1007_v62 = vld [vmem:[#allocation8 + $0x20] sm:$0xff]   ;;  %v1009_v0 = vld [vmem:[#allocation8 + $0x28] sm:$0xff]   ;;  %v98_v5 = vld [vmem:[%s1283_s2] sm:$0x3] }
  0x4d   :  { %v103_v7 = vrot.slane %v98_v5, %v102_v4  ;;  %v107_v8 = vrot.slane %v98_v5, %v106_v6  ;;  %v1011_v20 = vld [vmem:[#allocation8 + $0x30] sm:$0xff]   ;;  %v1012_v21 = vld [vmem:[#allocation8 + $0x78] sm:$0xff]  }
  0x4e   :  { %201 = vmatpush1.bf16.msra.mxu0 %v943_v19  ;;  %448 = vmatpush1.bf16.msra.mxu1 %v964_v28  ;;  %v1010_v19 = vld [vmem:[#allocation8 + $0x70] sm:$0xff]  }
  0x4f   :  { %202 = vmatprep.subr.bf16.mxu0 %v944_v22  ;;  %449 = vmatprep.subr.bf16.mxu1 %v965_v30  ;;  %v1013_v22 = vld [vmem:[#allocation8 + $0x38] sm:$0xff]  }
  0x52   :  { %203 = vmatpush1.bf16.msra.mxu0 %v946_v23  ;;  %450 = vmatpush1.bf16.msra.mxu1 %v967_v31  ;;  %v267_v23 = vld [vmem:[%s1285_s4] sm:$0x3] }
  0x53   :  { %204 = vmatprep.subr.bf16.mxu0 %v947_v26  ;;  %451 = vmatprep.subr.bf16.mxu1 %v968_v33  ;;  %v272_v24 = vrot.slane %v267_v23, %v102_v4  ;;  %v276_v25 = vrot.slane %v267_v23, %v106_v6 }
  0x56   :  { %205 = vmatpush1.bf16.msra.mxu0 %v949_v27  ;;  %452 = vmatpush1.bf16.msra.mxu1 %v970_v34 }
  0x57   :  { %453 = vmatprep.subr.bf16.mxu1 %v971_v35  ;;  %864 = vmatprep.subr.bf16.mxu0 %v998_v53  ;;  %v1014_v35 = vld [vmem:[%s1288_s7] sm:$0xff]  }
  0x58   :  { %v855_v53 = vld [vmem:[%s1289_s8] ss:$0 sm:$0xff] }
  0x59   :  { %223 = vmatmul.mubr.bf16.vlgmr.msra.gmra.mrb[0].mxu0 %v81_v32 }
  0x5a   :  { %454 = vmatpush1.bf16.msra.mxu1 %v973_v36  ;;  %865 = vmatpush3.bf16.msra.mxu0 %v999_v54 }
  0x5b   :  { %455 = vmatprep.subr.bf16.mxu1 %v974_v37  ;;  %866 = vmatprep.subr.bf16.mxu0 %v1000_v55  ;;  %v1015_v37 = vld [vmem:[%s1288_s7 + $0x8] sm:$0xff]  }
  0x5e   :  { %456 = vmatpush1.bf16.msra.mxu1 %v976_v38  ;;  %867 = vmatpush3.bf16.msra.mxu0 %v1001_v56  ;;  %v1016_v38 = vld [vmem:[%s1288_s7 + $0x10] sm:$0xff]  }
  0x5f   :  { %457 = vmatprep.subr.bf16.mxu1 %v977_v39  ;;  %868 = vmatprep.subr.bf16.mxu0 %v1002_v57  ;;  %v1017_v39 = vld [vmem:[%s1288_s7 + $0x18] sm:$0xff]  }
  0x62   :  { %458 = vmatpush1.bf16.msra.mxu1 %v979_v40  ;;  %869 = vmatpush3.bf16.msra.mxu0 %v1003_v58  ;;  %v1018_v40 = vld [vmem:[%s1288_s7 + $0x20] sm:$0xff]  }
  0x63   :  { %459 = vmatprep.subr.bf16.mxu1 %v980_v41  ;;  %870 = vmatprep.subr.bf16.mxu0 %v1004_v59  ;;  %v1019_v41 = vld [vmem:[%s1288_s7 + $0x28] sm:$0xff]  }
  0x66   :  { %460 = vmatpush1.bf16.msra.mxu1 %v982_v42  ;;  %871 = vmatpush3.bf16.msra.mxu0 %v1005_v60  ;;  %v1020_v42 = vld [vmem:[%s1288_s7 + $0x30] sm:$0xff]  }
  0x67   :  { %461 = vmatprep.subr.bf16.mxu1 %v983_v43  ;;  %872 = vmatprep.subr.bf16.mxu0 %v1006_v61  ;;  %v1021_v43 = vld [vmem:[%s1288_s7 + $0x38] sm:$0xff]   ;;  %s1126_s7 = smov [#allocation9]  }
  0x68   :  { %s780_s22 = sshll.u32 %s1126_s7, 4  ;;  %s781_s22 = int_to_ptr.vmem [resolvable:$true] %s780_s22 }
  0x69   :  { %p1093_p11 = scmp.lt.s32.totalorder %s781_s22, %s781_s22 }
  0x6a   :  { %462 = vmatpush1.bf16.msra.mxu1 %v985_v44  ;;  %873 = vmatpush3.bf16.msra.mxu0 %v1007_v62 }
  0x6b   :  { %463 = vmatprep.subr.bf16.mxu1 %v986_v45  ;;  %874 = vmatprep.subr.bf16.mxu0 %v1008_v63  ;;  %v838_v45 = vld [vmem:[%s1287_s6] ss:$0 sm:$0xff]  ;;  %s1088_s6 = scalar_lea.vmem %s781_s22, 128 }
  0x6c   :  { %p1089_p10 = scmp.ne.s32.totalorder %s781_s22, %s1088_s6  ;;  %p1094_p12 = scmp.lt.s32.totalorder %s1088_s6, %s1088_s6 }
  0x6e   :  { %464 = vmatpush1.bf16.msra.mxu1 %v988_v46  ;;  %875 = vmatpush3.bf16.msra.mxu0 %v1009_v0  ;;  %p1095_p13 = por %p1094_p12, %p1093_p11 }
  0x6f   :  { %465 = vmatprep.subr.bf16.mxu1 %v989_v47  ;;  %876 = vmatprep.subr.bf16.mxu0 %v1010_v19 }
  0x70   :  { %p1096_p0 = pnand %p1095_p13, %p1089_p10 }
  0x72   :  { %466 = vmatpush1.bf16.msra.mxu1 %v991_v48  ;;  %877 = vmatpush3.bf16.msra.mxu0 %v1011_v20 }
  0x73   :  { %467 = vmatprep.subr.bf16.mxu1 %v992_v49  ;;  %878 = vmatprep.subr.bf16.mxu0 %v1012_v21 }
  0x76   :  { %468 = vmatpush1.bf16.msra.mxu1 %v994_v50  ;;  %879 = vmatpush3.bf16.msra.mxu0 %v1013_v22 }
  0x77   :  { %469 = vmatprep.subr.bf16.mxu1 %v995_v51  ;;  %895 = vmatprep.subr.bf16.mxu0 %v1124_v1 }
  0x7a   :  { %470 = vmatpush1.bf16.msra.mxu1 %v997_v52 }
 0x12c   :  { %v224_v9 = vpop.f32.mrb[0].mxu0 }
 0x12d   :  { %v225_v10 = vadd.f32 %v224_v9, %v103_v7  ;;  %v226_v11 = vpop.f32.mrb[1].mxu0 }
 0x12e   :  { %v227_v12 = vadd.f32 %v226_v11, %v107_v8  ;;  %v228_v13 = vpop.f32.mrb[2].mxu0 }
 0x12f   :  { %v231_v14 = vmax.f32 %v225_v10, 0.0  ;;  %v229_v15 = vpop.f32.mrb[3].mxu0 }
 0x130   :  { %v232_v16 = vmax.f32 %v227_v12, 0.0 }
 0x131   :  { %v233_v18 = vpack.c.bf16 %v231_v14, %v231_v14 }
 0x132   :  { %v234_v17 = vpack.c.bf16 %v232_v16, %v232_v16 }
 0x134   :  { %471 = vmatprep.mubr.bf16.mxu1 %v234_v17 }
 0x135   :  { %472 = vmatmul.mubr.bf16.vlgmr.msra.gmra.mrb[0].mxu1 %v233_v18 }
 0x208   :  { %v473_v26 = vpop.f32.mrb[0].mxu1 }
 0x209   :  { %v474_v27 = vadd.f32 %v473_v26, %v272_v24  ;;  %v475_v28 = vpop.f32.mrb[1].mxu1 }
 0x20a   :  { %v476_v29 = vadd.f32 %v475_v28, %v276_v25  ;;  %v477_v30 = vpop.f32.mrb[2].mxu1 }
 0x20b   :  { %v480_v31 = vmax.f32 %v474_v27, 0.0  ;;  %v478_v32 = vpop.f32.mrb[3].mxu1 }
 0x20c   :  { %v481_v33 = vmax.f32 %v476_v29, 0.0 }
 0x20d   :  { %v482_v36 = vpack.c.bf16 %v480_v31, %v480_v31 }
 0x20e   :  { %v483_v34 = vpack.c.bf16 %v481_v33, %v481_v33 }
 0x210   :  { %651 = vmatprep.mubr.bf16.mxu0 %v483_v34 }
 0x211   :  { %652 = vmatmul.mubr.bf16.vlgmr.msra.gmra.mrb[4].mxu0 %v482_v36 }
 0x212   :  { %896 = vmatpush3.bf16.msra.mxu0 %v1014_v35  ;;  %911 = vmatprep.mubr.msk.bf16.mxu0 %vm1125_vm2, %v1124_v1 }
 0x213   :  { %897 = vmatprep.subr.bf16.mxu0 %v1124_v1 }
 0x216   :  { %898 = vmatpush3.bf16.msra.mxu0 %v1015_v37 }
 0x217   :  { %899 = vmatprep.subr.bf16.mxu0 %v1124_v1 }
 0x21a   :  { %900 = vmatpush3.bf16.msra.mxu0 %v1016_v38 }
 0x21b   :  { %901 = vmatprep.subr.bf16.mxu0 %v1124_v1 }
 0x21e   :  { %902 = vmatpush3.bf16.msra.mxu0 %v1017_v39 }
 0x21f   :  { %903 = vmatprep.subr.bf16.mxu0 %v1124_v1 }
 0x222   :  { %904 = vmatpush3.bf16.msra.mxu0 %v1018_v40 }
 0x223   :  { %905 = vmatprep.subr.bf16.mxu0 %v1124_v1 }
 0x226   :  { %906 = vmatpush3.bf16.msra.mxu0 %v1019_v41 }
 0x227   :  { %907 = vmatprep.subr.bf16.mxu0 %v1124_v1 }
 0x22a   :  { %908 = vmatpush3.bf16.msra.mxu0 %v1020_v42 }
 0x22b   :  { %909 = vmatprep.subr.bf16.mxu0 %v1124_v1 }
 0x22e   :  { %910 = vmatpush3.bf16.msra.mxu0 %v1021_v43 }
 0x2e4   :  { %v880_v44 = vpop.f32.mrb[4].mxu0 }
 0x2e5   :  { %v881_v46 = vpop.f32.mrb[5].mxu0 }
 0x2e6   :  { %v882_v47 = vadd.f32 %v881_v46, %v880_v44  ;;  %v883_v48 = vpop.f32.mrb[6].mxu0 }
 0x2e7   :  { %v884_v49 = vpop.f32.mrb[7].mxu0 }
 0x2e8   :  { %v654_v50 = vadd.f32 %v882_v47, %v838_v45 }
 0x2ea   :  { %v659_v51 = vmax.f32 %v654_v50, 0.0 }
 0x2ec   :  { %v660_v52 = vpack.c.bf16 %v659_v51, %v659_v51 }
 0x2ee   :  { %912 = vmatmul.mubr.bf16.vlgmr.msra.gmra.mrb[8].mxu0 %v660_v52 }
 0x3c1   :  { %v766_v1 = vpop.f32.mrb[8].mxu0 }
 0x3c2   :  { %v767_v54 = vadd.f32 %v855_v53, %v766_v1  ;;  %v913_v55 = vpop.f32.mrb[9].mxu0 }
 0x3c3   :  { %v769_v56 = vpop.f32.mrb[10].mxu0 }
 0x3c4   :  { %v914_v57 = vpop.f32.mrb[11].mxu0  ;;  %773 = vst.msk [vmem:[#allocation9] sm:$0xff] %vm772_vm3, %v767_v54 }
 0x3c5   :  { %1099 = shalt.err (!%p1096_p0)
}
 0x3c6   :  { %s1100_s8 = scalar_lea.hbm %s1290_s9, 128 }
 0x3c7   :  { %p1101_p1 = scmp.ne.s32.totalorder %s1290_s9, %s1100_s8  ;;  %p1104_p2 = scmp.lt.u32.totalorder %s1100_s8, %s1290_s9 }
 0x3c9   :  { %p1106_p3 = pnand %p1104_p2, %p1101_p1 }
 0x3cb   :  { %1109 = shalt.err (!%p1106_p3)
}
 0x3cc   :  { %783 = dma.vmem_to_hbm [thread:$0]  %s781_s22, 128, %s1290_s9, [#allocation5]  }
 0x3cd   :  { %1114 = dma.done.wait [#allocation5], 128  }
 0x3ce   :  { %1115 = vsyncadd [#allocation5], 4294967168 }
 0x3cf   :  { %787 = vsyncpa [#allocation4], 1 }
 0x3d0   :  { %788 = vsyncpa [#allocation7], 1 }
 0x3d1   :  { %789 = vsyncpa [#allocation5], 1 }

</bundles_post_ra>
